<compile_context>
chip_gen: v5e
topology: v5e:2x2
jax: 0.10.0
libtpu: 0.0.40
codegen_flags: <defaults>
</compile_context>

<pallas_src>
import jax
import jax.numpy as jnp
from jax.experimental import pallas as pl
from jax.experimental.pallas import tpu as pltpu


def _round_up(n, m):
    return ((n + m - 1) // m) * m


def _sigmoid(z):
    # sigmoid(z) == 0.5 * tanh(0.5*z) + 0.5 : one EUP push (tanh) + cheap VPU
    # mul/adds, vs two EUP pushes (exp, reciprocal) for the naive form.
    return 0.5 * jnp.tanh(0.5 * z) + 0.5


def dbn_kernel(x_ref, w1t_ref, b1_ref, w2t_ref, b2_ref, w3t_ref, b3_ref, out_ref):
    # Fused 3-layer MLP for one batch tile: three MXU matmuls (bf16 in, f32
    # accumulate) with f32 bias-add + tanh-form sigmoid.  Everything for the
    # tile is VMEM-resident; weights are reused across grid steps.
    x = x_ref[...].astype(jnp.bfloat16)                       # (tile_b, D)

    h1 = jnp.dot(x, w1t_ref[...], preferred_element_type=jnp.float32) + b1_ref[...]
    h1 = _sigmoid(h1)                                         # f32
    # drop1: identity (eval mode)

    h2 = jnp.dot(h1.astype(jnp.bfloat16), w2t_ref[...],
                 preferred_element_type=jnp.float32) + b2_ref[...]
    h2 = _sigmoid(h2)                                         # f32
    # drop2: identity (eval mode)

    y = jnp.dot(h2.astype(jnp.bfloat16), w3t_ref[...],
                preferred_element_type=jnp.float32) + b3_ref[...]
    out_ref[...] = _sigmoid(y).astype(out_ref.dtype)          # true O-wide store


def prepare_params(params):
    """One-time host-side prep: transpose weights to (in, out), cast MXU
    inputs to bf16, keep biases in f32 (1, out) rows.  No output padding."""
    w1, b1 = params["w1"], params["b1"]   # (H1, D), (H1,)
    w2, b2 = params["w2"], params["b2"]   # (H2, H1), (H2,)
    w3, b3 = params["w3"], params["b3"]   # (O, H2), (O,)
    H1, H2, O = w1.shape[0], w2.shape[0], w3.shape[0]
    return {
        "w1t": jnp.asarray(w1, jnp.float32).T.astype(jnp.bfloat16),   # (D, H1)
        "b1": jnp.asarray(b1, jnp.float32).reshape(1, H1),
        "w2t": jnp.asarray(w2, jnp.float32).T.astype(jnp.bfloat16),   # (H1, H2)
        "b2": jnp.asarray(b2, jnp.float32).reshape(1, H2),
        "w3t": jnp.asarray(w3, jnp.float32).T.astype(jnp.bfloat16),   # (H2, O)
        "b3": jnp.asarray(b3, jnp.float32).reshape(1, O),
    }


def dbn_forward(x, prep, *, tile_b=1024, min_grid_steps=2):
    """x: (B, D) float32. prep: output of prepare_params."""
    B, D = x.shape
    w1t, b1 = prep["w1t"], prep["b1"]
    w2t, b2 = prep["w2t"], prep["b2"]
    w3t, b3 = prep["w3t"], prep["b3"]
    H1, H2 = w1t.shape[1], w2t.shape[1]
    O = w3t.shape[1]

    # Batch tile: multiple of 8 sublanes, and small enough that the grid has
    # at least `min_grid_steps` steps (keeps both v7x TensorCores busy and
    # lets BlockSpec double-buffering overlap x/out DMA with compute).  At
    # these feature dims even tile_b=4096 is a few MiB double-buffered, far
    # under every generation's scoped-VMEM default, so VMEM never binds.
    tile_b = min(tile_b, _round_up(pl.cdiv(B, min_grid_steps), 8))
    tile_b = max(8, _round_up(tile_b, 8))
    B_pad = _round_up(B, tile_b)
    if B_pad != B:
        # Rare path (B not a multiple of tile_b): zero-pad so the last grid
        # step never reads uninitialized rows; padded rows sliced off below.
        x = jnp.pad(x, ((0, B_pad - B), (0, 0)))

    grid = (B_pad // tile_b,)

    # Weights/biases: constant block index -> fetched once, stay VMEM-resident
    # across grid steps (pipeline only re-DMAs when the block index changes).
    full = lambda shape: pl.BlockSpec(shape, lambda i: (0, 0))

    out = pl.pallas_call(
        dbn_kernel,
        out_shape=jax.ShapeDtypeStruct((B_pad, O), jnp.float32),
        grid_spec=pltpu.PrefetchScalarGridSpec(
            num_scalar_prefetch=0,
            grid=grid,
            in_specs=[
                pl.BlockSpec((tile_b, D), lambda i: (i, 0)),   # x tile over batch
                full((D, H1)), full((1, H1)),
                full((H1, H2)), full((1, H2)),
                full((H2, O)), full((1, O)),
            ],
            out_specs=pl.BlockSpec((tile_b, O), lambda i: (i, 0)),
        ),
        compiler_params=pltpu.CompilerParams(
            dimension_semantics=("parallel",)),   # megacore-shardable on v7x
    )(x, w1t, b1, w2t, b2, w3t, b3)

    return out if B_pad == B else out[:B]


def init_params(key, n_visible, h1, h2, output_dim):
    """Deterministic init mirroring the module:
       fc1 <- rbm1.W (randn*0.01), rbm1.h_bias (zeros)
       fc2 <- rbm2.W (randn*0.01), rbm2.h_bias (zeros)
       out <- fresh Linear (small random init here, deterministic)."""
    k1, k2, k3, k4 = jax.random.split(key, 4)
    return {
        "w1": jax.random.normal(k1, (h1, n_visible), jnp.float32) * 0.01,
        "b1": jnp.zeros((h1,), jnp.float32),
        "w2": jax.random.normal(k2, (h2, h1), jnp.float32) * 0.01,
        "b2": jnp.zeros((h2,), jnp.float32),
        "w3": jax.random.normal(k3, (output_dim, h2), jnp.float32) * 0.01,
        "b3": jax.random.normal(k4, (output_dim,), jnp.float32) * 0.01,
    }


def dbn_reference_bf16(x, p):
    """Plain-JAX reference of the exact kernel math: bf16 matmul inputs,
       f32 accumulation / bias, tanh-form sigmoid."""
    bf = jnp.bfloat16
    h1 = _sigmoid(
        jnp.dot(x.astype(bf), p["w1"].T.astype(bf),
                preferred_element_type=jnp.float32) + p["b1"])
    h2 = _sigmoid(
        jnp.dot(h1.astype(bf), p["w2"].T.astype(bf),
                preferred_element_type=jnp.float32) + p["b2"])
    y = jnp.dot(h2.astype(bf), p["w3"].T.astype(bf),
                preferred_element_type=jnp.float32) + p["b3"]
    return _sigmoid(y)


def dbn_reference_f32(x, p):
    """Pure-f32 reference of the module forward (eval-mode dropout)."""
    h1 = jax.nn.sigmoid(x @ p["w1"].T + p["b1"])
    h2 = jax.nn.sigmoid(h1 @ p["w2"].T + p["b2"])
    return jax.nn.sigmoid(h2 @ p["w3"].T + p["b3"])


if __name__ == "__main__":
    # Shapes consistent with the module:
    #   n_visible (X_scaled.shape[1]) = 16, rbm1.n_hidden = 64,
    #   rbm2.n_hidden = 128, output_dim = 8.
    # B=256 with min_grid_steps=2 -> tile_b=128, a 2-step grid: exercises
    # DMA/compute pipelining and v7x dual-core sharding even at small size.
    B, D, H1, H2, O = 256, 16, 64, 128, 8

    key = jax.random.PRNGKey(0)
    kx, kp = jax.random.split(key)
    x = jax.random.normal(kx, (B, D), jnp.float32)
    params = init_params(kp, D, H1, H2, O)
    prep = prepare_params(params)   # one-time transpose / bf16 cast

    fwd = jax.jit(dbn_forward, static_argnames=("tile_b", "min_grid_steps"))
    y = fwd(x, prep, tile_b=1024, min_grid_steps=2)
    y = jax.block_until_ready(y)
    assert y.shape == (B, O)

    # Tight check against a reference that uses the same bf16-matmul /
    # f32-accumulate / tanh-sigmoid math as the kernel.
    y_ref = dbn_reference_bf16(x, params)
    assert jnp.allclose(y, y_ref, atol=1e-4, rtol=1e-4), "mismatch vs bf16 reference"

    # Loose sanity check against the pure-f32 module semantics (bf16 weight
    # rounding accounts for the small difference).
    y_f32 = dbn_reference_f32(x, params)
    assert jnp.allclose(y, y_f32, atol=5e-3, rtol=5e-3), "mismatch vs f32 reference"

    print("KERNEL_OK")
</pallas_src>

<mosaic_0001>
module attributes {stable_mosaic.version = 11 : i64} {
  func.func @dbn_kernel(%arg0: i32, %arg1: memref<128x16xf32, #tpu.memory_space<vmem>>, %arg2: memref<16x64xbf16, #tpu.memory_space<vmem>>, %arg3: memref<1x64xf32, #tpu.memory_space<vmem>>, %arg4: memref<64x128xbf16, #tpu.memory_space<vmem>>, %arg5: memref<1x128xf32, #tpu.memory_space<vmem>>, %arg6: memref<128x8xbf16, #tpu.memory_space<vmem>>, %arg7: memref<1x8xf32, #tpu.memory_space<vmem>>, %arg8: memref<128x8xf32, #tpu.memory_space<vmem>>) attributes {dimension_semantics = [#tpu.dimension_semantics<parallel>], iteration_bounds = array<i64: 2>, scalar_prefetch = 0 : i64, scratch_operands = 0 : i64, tpu.core_type = #tpu.core_type<tc>, window_params = [{transform_indices = @transform_0, window_bounds = array<i64: 128, 16>}, {pipeline_mode = #tpu.pipeline_mode<synchronous>, transform_indices = @transform_1, window_bounds = array<i64: 16, 64>}, {pipeline_mode = #tpu.pipeline_mode<synchronous>, transform_indices = @transform_2, window_bounds = array<i64: 1, 64>}, {pipeline_mode = #tpu.pipeline_mode<synchronous>, transform_indices = @transform_3, window_bounds = array<i64: 64, 128>}, {pipeline_mode = #tpu.pipeline_mode<synchronous>, transform_indices = @transform_4, window_bounds = array<i64: 1, 128>}, {pipeline_mode = #tpu.pipeline_mode<synchronous>, transform_indices = @transform_5, window_bounds = array<i64: 128, 8>}, {pipeline_mode = #tpu.pipeline_mode<synchronous>, transform_indices = @transform_6, window_bounds = array<i64: 1, 8>}, {transform_indices = @transform_7, window_bounds = array<i64: 128, 8>}]} {
    %c0 = arith.constant 0 : index
    %c0_0 = arith.constant 0 : index
    %0 = vector.load %arg1[%c0, %c0_0] : memref<128x16xf32, #tpu.memory_space<vmem>>, vector<128x16xf32>
    %1 = arith.truncf %0 : vector<128x16xf32> to vector<128x16xbf16>
    %c0_1 = arith.constant 0 : index
    %c0_2 = arith.constant 0 : index
    %2 = vector.load %arg2[%c0_1, %c0_2] : memref<16x64xbf16, #tpu.memory_space<vmem>>, vector<16x64xbf16>
    %cst = arith.constant dense<0.000000e+00> : vector<128x64xf32>
    %3 = tpu.matmul %1, %2, %cst {dimension_numbers = #tpu.dot_dimension_numbers<[1], [0], [0], [1], [0, 0, 1, 1], [], []>} : vector<128x16xbf16>, vector<16x64xbf16>, vector<128x64xf32> -> vector<128x64xf32>
    %c0_3 = arith.constant 0 : index
    %c0_4 = arith.constant 0 : index
    %4 = vector.load %arg3[%c0_3, %c0_4] : memref<1x64xf32, #tpu.memory_space<vmem>>, vector<1x64xf32>
    %5 = vector.broadcast %4 : vector<1x64xf32> to vector<128x64xf32>
    %6 = arith.addf %3, %5 : vector<128x64xf32>
    %cst_5 = arith.constant 5.000000e-01 : f32
    %7 = vector.broadcast %cst_5 : f32 to vector<128x64xf32>
    %8 = arith.mulf %7, %6 : vector<128x64xf32>
    %9 = math.tanh %8 : vector<128x64xf32>
    %cst_6 = arith.constant 5.000000e-01 : f32
    %10 = vector.broadcast %cst_6 : f32 to vector<128x64xf32>
    %11 = arith.mulf %10, %9 : vector<128x64xf32>
    %cst_7 = arith.constant 5.000000e-01 : f32
    %12 = vector.broadcast %cst_7 : f32 to vector<128x64xf32>
    %13 = arith.addf %11, %12 : vector<128x64xf32>
    %14 = arith.truncf %13 : vector<128x64xf32> to vector<128x64xbf16>
    %c0_8 = arith.constant 0 : index
    %c0_9 = arith.constant 0 : index
    %15 = vector.load %arg4[%c0_8, %c0_9] : memref<64x128xbf16, #tpu.memory_space<vmem>>, vector<64x128xbf16>
    %cst_10 = arith.constant dense<0.000000e+00> : vector<128x128xf32>
    %16 = tpu.matmul %14, %15, %cst_10 {dimension_numbers = #tpu.dot_dimension_numbers<[1], [0], [0], [1], [0, 0, 1, 1], [], []>} : vector<128x64xbf16>, vector<64x128xbf16>, vector<128x128xf32> -> vector<128x128xf32>
    %c0_11 = arith.constant 0 : index
    %c0_12 = arith.constant 0 : index
    %17 = vector.load %arg5[%c0_11, %c0_12] : memref<1x128xf32, #tpu.memory_space<vmem>>, vector<1x128xf32>
    %18 = vector.broadcast %17 : vector<1x128xf32> to vector<128x128xf32>
    %19 = arith.addf %16, %18 : vector<128x128xf32>
    %cst_13 = arith.constant 5.000000e-01 : f32
    %20 = vector.broadcast %cst_13 : f32 to vector<128x128xf32>
    %21 = arith.mulf %20, %19 : vector<128x128xf32>
    %22 = math.tanh %21 : vector<128x128xf32>
    %cst_14 = arith.constant 5.000000e-01 : f32
    %23 = vector.broadcast %cst_14 : f32 to vector<128x128xf32>
    %24 = arith.mulf %23, %22 : vector<128x128xf32>
    %cst_15 = arith.constant 5.000000e-01 : f32
    %25 = vector.broadcast %cst_15 : f32 to vector<128x128xf32>
    %26 = arith.addf %24, %25 : vector<128x128xf32>
    %27 = arith.truncf %26 : vector<128x128xf32> to vector<128x128xbf16>
    %c0_16 = arith.constant 0 : index
    %c0_17 = arith.constant 0 : index
    %28 = vector.load %arg6[%c0_16, %c0_17] : memref<128x8xbf16, #tpu.memory_space<vmem>>, vector<128x8xbf16>
    %cst_18 = arith.constant dense<0.000000e+00> : vector<128x8xf32>
    %29 = tpu.matmul %27, %28, %cst_18 {dimension_numbers = #tpu.dot_dimension_numbers<[1], [0], [0], [1], [0, 0, 1, 1], [], []>} : vector<128x128xbf16>, vector<128x8xbf16>, vector<128x8xf32> -> vector<128x8xf32>
    %c0_19 = arith.constant 0 : index
    %c0_20 = arith.constant 0 : index
    %30 = vector.load %arg7[%c0_19, %c0_20] : memref<1x8xf32, #tpu.memory_space<vmem>>, vector<1x8xf32>
    %31 = vector.broadcast %30 : vector<1x8xf32> to vector<128x8xf32>
    %32 = arith.addf %29, %31 : vector<128x8xf32>
    %cst_21 = arith.constant 5.000000e-01 : f32
    %33 = vector.broadcast %cst_21 : f32 to vector<128x8xf32>
    %34 = arith.mulf %33, %32 : vector<128x8xf32>
    %35 = math.tanh %34 : vector<128x8xf32>
    %cst_22 = arith.constant 5.000000e-01 : f32
    %36 = vector.broadcast %cst_22 : f32 to vector<128x8xf32>
    %37 = arith.mulf %36, %35 : vector<128x8xf32>
    %cst_23 = arith.constant 5.000000e-01 : f32
    %38 = vector.broadcast %cst_23 : f32 to vector<128x8xf32>
    %39 = arith.addf %37, %38 : vector<128x8xf32>
    %c0_24 = arith.constant 0 : index
    %c0_25 = arith.constant 0 : index
    %40 = vector.load %arg8[%c0_24, %c0_25] : memref<128x8xf32, #tpu.memory_space<vmem>>, vector<128x8xf32>
    tpu.vector_store %arg8[%c0_24, %c0_25], %39 {strides = array<i32>} : memref<128x8xf32, #tpu.memory_space<vmem>>, vector<128x8xf32>,
    return
  }
  func.func @transform_0(%arg0: i32) -> (i32, i32) {
    %c0_i32 = arith.constant 0 : i32
    %c0_i32_0 = arith.constant 0 : i32
    return %arg0, %c0_i32 : i32, i32
  }
  func.func @transform_1(%arg0: i32) -> (i32, i32) {
    %c0_i32 = arith.constant 0 : i32
    %c0_i32_0 = arith.constant 0 : i32
    %c0_i32_1 = arith.constant 0 : i32
    return %c0_i32, %c0_i32_0 : i32, i32
  }
  func.func @transform_2(%arg0: i32) -> (i32, i32) {
    %c0_i32 = arith.constant 0 : i32
    %c0_i32_0 = arith.constant 0 : i32
    %c0_i32_1 = arith.constant 0 : i32
    return %c0_i32, %c0_i32_0 : i32, i32
  }
  func.func @transform_3(%arg0: i32) -> (i32, i32) {
    %c0_i32 = arith.constant 0 : i32
    %c0_i32_0 = arith.constant 0 : i32
    %c0_i32_1 = arith.constant 0 : i32
    return %c0_i32, %c0_i32_0 : i32, i32
  }
  func.func @transform_4(%arg0: i32) -> (i32, i32) {
    %c0_i32 = arith.constant 0 : i32
    %c0_i32_0 = arith.constant 0 : i32
    %c0_i32_1 = arith.constant 0 : i32
    return %c0_i32, %c0_i32_0 : i32, i32
  }
  func.func @transform_5(%arg0: i32) -> (i32, i32) {
    %c0_i32 = arith.constant 0 : i32
    %c0_i32_0 = arith.constant 0 : i32
    %c0_i32_1 = arith.constant 0 : i32
    return %c0_i32, %c0_i32_0 : i32, i32
  }
  func.func @transform_6(%arg0: i32) -> (i32, i32) {
    %c0_i32 = arith.constant 0 : i32
    %c0_i32_0 = arith.constant 0 : i32
    %c0_i32_1 = arith.constant 0 : i32
    return %c0_i32, %c0_i32_0 : i32, i32
  }
  func.func @transform_7(%arg0: i32) -> (i32, i32) {
    %c0_i32 = arith.constant 0 : i32
    %c0_i32_0 = arith.constant 0 : i32
    return %arg0, %c0_i32 : i32, i32
  }
}

</mosaic_0001>

<bundles_post_ra>
// kernel: dbn_forward.1
= control target key start
LH: loop header
LB: loop body
LE: loop exit
PB: predicated region body
PF: predicated region fallthrough
CT: control target
= control target key end

     0   :  { %s1156_s24 = smov 0   ;;  %s1350_s0 = inlined_call_operand.vmem [shape: f32[256,16], index: 0, kind: input, shape index: {}]   ;;  %s1351_s1 = inlined_call_operand.vmem [shape: bf16[16,64], index: 1, kind: input, shape index: {}]   ;;  %s1352_s2 = inlined_call_operand.vmem [shape: f32[1,64], index: 2, kind: input, shape index: {}]   ;;  %s1353_s3 = inlined_call_operand.vmem [shape: bf16[64,128], index: 3, kind: input, shape index: {}]   ;;  %s1354_s4 = inlined_call_operand.vmem [shape: f32[1,128], index: 4, kind: input, shape index: {}]   ;;  %s1355_s5 = inlined_call_operand.vmem [shape: bf16[128,8], index: 5, kind: input, shape index: {}]   ;;  %s1356_s6 = inlined_call_operand.vmem [shape: f32[1,8], index: 6, kind: input, shape index: {}]   ;;  %s1357_s7 = inlined_call_operand.vmem [shape: f32[256,8], index: 7, kind: output, shape index: {}]  }
   0x1 LB: > { %s901_s25 = sadd.s32 4294967295, %s1114_s24   ;;  %p905_p0 = scmp.ge.s32.totalorder %s1114_s24, 1  ;;  %s1114_s24 = sphi %s1156_s24, %s17_s24  }
   0x2   : > { %p238_p1 = scmp.lt.s32.totalorder %s1114_s24, 3 }
   0x4   : > { %p239_p2 = pnand %p905_p0, %p238_p1 }
   0x5   : > { %s906_s28 = sshll.u32 (!%p239_p2), %s901_s25, 4 }
   0x6   : > { %242 = sbr.rel (%p239_p2) target bundleno = 587 (0x24b), region = 48  ;;  %p271_p3 = scmp.lt.s32.totalorder (!%p239_p2), %s906_s28, 31 }
   0xb   : > { %v980_v0 = vld [vmem:[%s1351_s1] sm:$0xff]  ;;  %s1359_s28 = smov (!%p271_p3, %s906_s28), 31  ;;  %vm319_vm0 = vcmask 130048   ;;  %v984_v22 = vld [vmem:[%s1353_s3 + $0x18] sm:$0xff]  ;;  %v983_v25 = vld [vmem:[%s1353_s3 + $0x10] sm:$0xff]  ;;  %vm501_vm1 = vcmask 523264  }
   0xc   : > { %351 = vmatpush.bf16.msra.mxu0 %v980_v0  ;;  %s907_s29 = sshll.u32 %s1359_s28, 3  ;;  %530 = vmatpush.bf16.msra.mxu1 %v984_v22  ;;  %v982_v27 = vld [vmem:[%s1353_s3 + $0x8] sm:$0xff]  ;;  %v981_v28 = vld [vmem:[%s1353_s3] sm:$0xff]  ;;  %vm828_vm2 = vcmask 64512  }
   0xd   : > { %s1175_s9 = scalar_lea.vmem %s1350_s0, %s907_s29  ;;  %v1216_v29 = vld [vmem:[%s1352_s2] ss:$0 sm:$0xff]  ;;  %s1299_s22 = scalar_lea.vmem %s1357_s7, %s907_s29 }
   0xe   : > { %v283_v1 = vld [vmem:[%s1175_s9] sm:$0xff]  ;;  %v284_v2 = vld [vmem:[%s1175_s9 + $0x8] sm:$0xff]  ;;  %v285_v4 = vld [vmem:[%s1175_s9 + $0x10] sm:$0xff] }
   0xf   : > { %v299_v3 = vpack.c.bf16 %v284_v2, %v283_v1  ;;  %v286_v5 = vld [vmem:[%s1175_s9 + $0x18] sm:$0xff]  ;;  %v287_v7 = vld [vmem:[%s1175_s9 + $0x20] sm:$0xff]  ;;  %v288_v8 = vld [vmem:[%s1175_s9 + $0x28] sm:$0xff] }
  0x10   : > { %v300_v6 = vpack.c.bf16 %v286_v5, %v285_v4  ;;  %v301_v9 = vpack.c.bf16 %v288_v8, %v287_v7  ;;  %v289_v10 = vld [vmem:[%s1175_s9 + $0x30] sm:$0xff]  ;;  %v290_v11 = vld [vmem:[%s1175_s9 + $0x38] sm:$0xff]  ;;  %v291_v13 = vld [vmem:[%s1175_s9 + $0x40] sm:$0xff]  ;;  %531 = vmatpush.bf16.msra.mxu1 %v983_v25 }
  0x11   : > { %914 = vmatmul.msk.bf16.vlgmr.msra.gmra.mxu0 %vm319_vm0, %v299_v3  ;;  %v302_v12 = vpack.c.bf16 %v290_v11, %v289_v10  ;;  %v292_v14 = vld [vmem:[%s1175_s9 + $0x48] sm:$0xff]  ;;  %v293_v16 = vld [vmem:[%s1175_s9 + $0x50] sm:$0xff]  ;;  %v294_v17 = vld [vmem:[%s1175_s9 + $0x58] sm:$0xff] }
  0x12   : > { %v303_v15 = vpack.c.bf16 %v292_v14, %v291_v13  ;;  %v304_v18 = vpack.c.bf16 %v294_v17, %v293_v16  ;;  %v295_v19 = vld [vmem:[%s1175_s9 + $0x60] sm:$0xff]  ;;  %v296_v20 = vld [vmem:[%s1175_s9 + $0x68] sm:$0xff]  ;;  %v297_v23 = vld [vmem:[%s1175_s9 + $0x70] sm:$0xff] }
  0x13   : > { %v305_v21 = vpack.c.bf16 %v296_v20, %v295_v19  ;;  %v298_v24 = vld [vmem:[%s1175_s9 + $0x78] sm:$0xff] }
  0x14   : > { %v306_v26 = vpack.c.bf16 %v298_v24, %v297_v23  ;;  %532 = vmatpush.bf16.msra.mxu1 %v982_v27 }
  0x18   : > { %533 = vmatpush.bf16.msra.mxu1 %v981_v28 }
  0x21   : > { %915 = vmatmul.msk.bf16.gmra.mxu0 %vm319_vm0, %v300_v6 }
  0x31   : > { %916 = vmatmul.msk.bf16.gmra.mxu0 %vm319_vm0, %v301_v9 }
  0x41   : > { %917 = vmatmul.msk.bf16.gmra.mxu0 %vm319_vm0, %v302_v12 }
  0x51   : > { %918 = vmatmul.msk.bf16.gmra.mxu0 %vm319_vm0, %v303_v15 }
  0x61   : > { %919 = vmatmul.msk.bf16.gmra.mxu0 %vm319_vm0, %v304_v18 }
  0x71   : > { %920 = vmatmul.msk.bf16.gmra.mxu0 %vm319_vm0, %v305_v21 }
  0x81   : > { %921 = vmatmul.msk.bf16.gmra.mxu0 %vm319_vm0, %v306_v26 }
  0x8e   : > { %v353_v30 = vpop.f32.mrf.mxu0 }
  0x8f   : > { %v354_v31 = vadd.f32 %v1216_v29, %v353_v30 }
  0x91   : > { %v393_v32 = vmul.f32 0.5, %v354_v31 }
  0x93   : > { %1012 = vtanh.f32 %v393_v32 }
  0x96   : > { %v355_v33 = vpop.f32.mrf.mxu0 }
  0x97   : > { %v356_v34 = vadd.f32 %v1216_v29, %v355_v33 }
  0x99   : > { %v394_v35 = vmul.f32 0.5, %v356_v34  ;;  %v1013_v36 = vpop.eup %1012 }
  0x9a   : > { %v425_v39 = vmul.f32 0.5, %v1013_v36 }
  0x9b   : > { %1014 = vtanh.f32 %v394_v35 }
  0x9c   : > { %v441_v43 = vadd.f32 0.5, %v425_v39 }
  0x9e   : > { %v358_v37 = vpop.f32.mrf.mxu0 }
  0x9f   : > { %v359_v38 = vadd.f32 %v1216_v29, %v358_v37 }
  0xa1   : > { %v1015_v40 = vpop.eup %1014  ;;  %v395_v42 = vmul.f32 0.5, %v359_v38 }
  0xa2   : > { %v426_v41 = vmul.f32 0.5, %v1015_v40 }
  0xa3   : > { %1016 = vtanh.f32 %v395_v42 }
  0xa4   : > { %v442_v44 = vadd.f32 0.5, %v426_v41 }
  0xa6   : > { %v360_v45 = vpop.f32.mrf.mxu0  ;;  %v457_v46 = vpack.c.bf16 %v442_v44, %v441_v43 }
  0xa7   : > { %v361_v47 = vadd.f32 %v1216_v29, %v360_v45 }
  0xa8   : > { %938 = vmatmul.msk.bf16.vlgmr.msra.gmra.mxu1 %vm501_vm1, %v457_v46 }
  0xa9   : > { %v396_v48 = vmul.f32 0.5, %v361_v47  ;;  %v1017_v49 = vpop.eup %1016 }
  0xaa   : > { %v427_v52 = vmul.f32 0.5, %v1017_v49 }
  0xab   : > { %1018 = vtanh.f32 %v396_v48 }
  0xac   : > { %v443_v56 = vadd.f32 0.5, %v427_v52  ;;  %v991_v52 = vld [vmem:[%s1355_s5 + $0x30] sm:$0xff] }
  0xae   : > { %v363_v50 = vpop.f32.mrf.mxu0 }
  0xaf   : > { %v364_v51 = vadd.f32 %v1216_v29, %v363_v50  ;;  %v992_v50 = vld [vmem:[%s1355_s5 + $0x38] sm:$0xff] }
  0xb0   : > { %715 = vmatpush.bf16.msra.mxu2 %v992_v50  ;;  %993 = vmatpush.bf16.msra.mxu3 %v992_v50 }
  0xb1   : > { %v1019_v53 = vpop.eup %1018  ;;  %v397_v55 = vmul.f32 0.5, %v364_v51 }
  0xb2   : > { %v428_v54 = vmul.f32 0.5, %v1019_v53 }
  0xb3   : > { %1020 = vtanh.f32 %v397_v55 }
  0xb4   : > { %v444_v57 = vadd.f32 0.5, %v428_v54  ;;  %716 = vmatpush.bf16.msra.mxu2 %v991_v52  ;;  %994 = vmatpush.bf16.msra.mxu3 %v991_v52 }
  0xb6   : > { %v365_v58 = vpop.f32.mrf.mxu0  ;;  %v458_v59 = vpack.c.bf16 %v444_v57, %v443_v56 }
  0xb7   : > { %v366_v60 = vadd.f32 %v1216_v29, %v365_v58 }
  0xb8   : > { %939 = vmatmul.msk.bf16.gmra.mxu1 %vm501_vm1, %v458_v59 }
  0xb9   : > { %v398_v61 = vmul.f32 0.5, %v366_v60  ;;  %v1021_v62 = vpop.eup %1020 }
  0xba   : > { %v429_v1 = vmul.f32 0.5, %v1021_v62 }
  0xbb   : > { %1022 = vtanh.f32 %v398_v61 }
  0xbc   : > { %v445_v5 = vadd.f32 0.5, %v429_v1 }
  0xbe   : > { %v368_v63 = vpop.f32.mrf.mxu0 }
  0xbf   : > { %v369_v0 = vadd.f32 %v1216_v29, %v368_v63 }
  0xc1   : > { %v1023_v2 = vpop.eup %1022  ;;  %v399_v4 = vmul.f32 0.5, %v369_v0  ;;  %v990_v0 = vld [vmem:[%s1355_s5 + $0x28] sm:$0xff] }
  0xc2   : > { %v430_v3 = vmul.f32 0.5, %v1023_v2  ;;  %717 = vmatpush.bf16.msra.mxu2 %v990_v0  ;;  %995 = vmatpush.bf16.msra.mxu3 %v990_v0 }
  0xc3   : > { %1024 = vtanh.f32 %v399_v4 }
  0xc4   : > { %v446_v6 = vadd.f32 0.5, %v430_v3  ;;  %v989_v3 = vld [vmem:[%s1355_s5 + $0x20] sm:$0xff] }
  0xc6   : > { %v370_v7 = vpop.f32.mrf.mxu0  ;;  %v459_v8 = vpack.c.bf16 %v446_v6, %v445_v5  ;;  %718 = vmatpush.bf16.msra.mxu2 %v989_v3  ;;  %996 = vmatpush.bf16.msra.mxu3 %v989_v3  ;;  %v988_v5 = vld [vmem:[%s1355_s5 + $0x18] sm:$0xff] }
  0xc7   : > { %v371_v9 = vadd.f32 %v1216_v29, %v370_v7 }
  0xc8   : > { %940 = vmatmul.msk.bf16.gmra.mxu1 %vm501_vm1, %v459_v8  ;;  %v987_v8 = vld [vmem:[%s1355_s5 + $0x10] sm:$0xff] }
  0xc9   : > { %v400_v10 = vmul.f32 0.5, %v371_v9  ;;  %v1025_v11 = vpop.eup %1024 }
  0xca   : > { %v431_v14 = vmul.f32 0.5, %v1025_v11  ;;  %719 = vmatpush.bf16.msra.mxu2 %v988_v5  ;;  %997 = vmatpush.bf16.msra.mxu3 %v988_v5 }
  0xcb   : > { %1026 = vtanh.f32 %v400_v10 }
  0xcc   : > { %v447_v18 = vadd.f32 0.5, %v431_v14  ;;  %v1269_v14 = vld [vmem:[%s1354_s4] ss:$0 sm:$0xff] }
  0xce   : > { %v373_v12 = vpop.f32.mrf.mxu0  ;;  %720 = vmatpush.bf16.msra.mxu2 %v987_v8  ;;  %998 = vmatpush.bf16.msra.mxu3 %v987_v8 }
  0xcf   : > { %v374_v13 = vadd.f32 %v1216_v29, %v373_v12  ;;  %v986_v12 = vld [vmem:[%s1355_s5 + $0x8] sm:$0xff] }
  0xd1   : > { %v1027_v15 = vpop.eup %1026  ;;  %v401_v17 = vmul.f32 0.5, %v374_v13  ;;  %v985_v13 = vld [vmem:[%s1355_s5] sm:$0xff] }
  0xd2   : > { %v432_v16 = vmul.f32 0.5, %v1027_v15  ;;  %721 = vmatpush.bf16.msra.mxu2 %v986_v12  ;;  %999 = vmatpush.bf16.msra.mxu3 %v986_v12 }
  0xd3   : > { %1028 = vtanh.f32 %v401_v17 }
  0xd4   : > { %v448_v19 = vadd.f32 0.5, %v432_v16 }
  0xd6   : > { %v375_v20 = vpop.f32.mrf.mxu0  ;;  %v460_v21 = vpack.c.bf16 %v448_v19, %v447_v18  ;;  %722 = vmatpush.bf16.msra.mxu2 %v985_v13  ;;  %1000 = vmatpush.bf16.msra.mxu3 %v985_v13 }
  0xd7   : > { %v376_v22 = vadd.f32 %v1216_v29, %v375_v20 }
  0xd8   : > { %941 = vmatmul.msk.bf16.gmra.mxu1 %vm501_vm1, %v460_v21 }
  0xd9   : > { %v402_v23 = vmul.f32 0.5, %v376_v22  ;;  %v1029_v24 = vpop.eup %1028 }
  0xda   : > { %v433_v27 = vmul.f32 0.5, %v1029_v24 }
  0xdb   : > { %1030 = vtanh.f32 %v402_v23 }
  0xdc   : > { %v449_v32 = vadd.f32 0.5, %v433_v27 }
  0xde   : > { %v378_v25 = vpop.f32.mrf.mxu0 }
  0xdf   : > { %v379_v26 = vadd.f32 %v1216_v29, %v378_v25 }
  0xe1   : > { %v1031_v28 = vpop.eup %1030  ;;  %v403_v31 = vmul.f32 0.5, %v379_v26 }
  0xe2   : > { %v434_v30 = vmul.f32 0.5, %v1031_v28 }
  0xe3   : > { %1032 = vtanh.f32 %v403_v31 }
  0xe4   : > { %v450_v33 = vadd.f32 0.5, %v434_v30 }
  0xe6   : > { %v380_v34 = vpop.f32.mrf.mxu0  ;;  %v461_v35 = vpack.c.bf16 %v450_v33, %v449_v32 }
  0xe7   : > { %v381_v36 = vadd.f32 %v1216_v29, %v380_v34 }
  0xe8   : > { %942 = vmatmul.msk.bf16.gmra.mxu1 %vm501_vm1, %v461_v35 }
  0xe9   : > { %v404_v37 = vmul.f32 0.5, %v381_v36  ;;  %v1033_v38 = vpop.eup %1032 }
  0xea   : > { %v435_v41 = vmul.f32 0.5, %v1033_v38 }
  0xeb   : > { %1034 = vtanh.f32 %v404_v37 }
  0xec   : > { %v451_v45 = vadd.f32 0.5, %v435_v41 }
  0xee   : > { %v383_v39 = vpop.f32.mrf.mxu0 }
  0xef   : > { %v384_v40 = vadd.f32 %v1216_v29, %v383_v39 }
  0xf1   : > { %v1035_v42 = vpop.eup %1034  ;;  %v405_v44 = vmul.f32 0.5, %v384_v40 }
  0xf2   : > { %v436_v43 = vmul.f32 0.5, %v1035_v42 }
  0xf3   : > { %1036 = vtanh.f32 %v405_v44 }
  0xf4   : > { %v452_v46 = vadd.f32 0.5, %v436_v43 }
  0xf6   : > { %v385_v47 = vpop.f32.mrf.mxu0  ;;  %v462_v48 = vpack.c.bf16 %v452_v46, %v451_v45 }
  0xf7   : > { %v386_v49 = vadd.f32 %v1216_v29, %v385_v47 }
  0xf8   : > { %943 = vmatmul.msk.bf16.gmra.mxu1 %vm501_vm1, %v462_v48 }
  0xf9   : > { %v406_v51 = vmul.f32 0.5, %v386_v49  ;;  %v1037_v53 = vpop.eup %1036 }
  0xfa   : > { %v437_v56 = vmul.f32 0.5, %v1037_v53 }
  0xfb   : > { %1038 = vtanh.f32 %v406_v51 }
  0xfc   : > { %v453_v60 = vadd.f32 0.5, %v437_v56 }
  0xfe   : > { %v388_v54 = vpop.f32.mrf.mxu0 }
  0xff   : > { %v389_v55 = vadd.f32 %v1216_v29, %v388_v54 }
 0x101   : > { %v1039_v57 = vpop.eup %1038  ;;  %v407_v59 = vmul.f32 0.5, %v389_v55 }
 0x102   : > { %v438_v58 = vmul.f32 0.5, %v1039_v57 }
 0x103   : > { %1040 = vtanh.f32 %v407_v59 }
 0x104   : > { %v454_v61 = vadd.f32 0.5, %v438_v58 }
 0x106   : > { %v390_v62 = vpop.f32.mrf.mxu0  ;;  %v463_v63 = vpack.c.bf16 %v454_v61, %v453_v60 }
 0x107   : > { %v391_v1 = vadd.f32 %v1216_v29, %v390_v62 }
 0x108   : > { %944 = vmatmul.msk.bf16.gmra.mxu1 %vm501_vm1, %v463_v63 }
 0x109   : > { %v408_v2 = vmul.f32 0.5, %v391_v1  ;;  %v1041_v4 = vpop.eup %1040 }
 0x10a   : > { %v439_v6 = vmul.f32 0.5, %v1041_v4 }
 0x10b   : > { %1042 = vtanh.f32 %v408_v2 }
 0x10c   : > { %v455_v9 = vadd.f32 0.5, %v439_v6 }
 0x111   : > { %v1043_v29 = vpop.eup %1042 }
 0x112   : > { %v440_v7 = vmul.f32 0.5, %v1043_v29 }
 0x114   : > { %v456_v10 = vadd.f32 0.5, %v440_v7 }
 0x116   : > { %v464_v11 = vpack.c.bf16 %v456_v10, %v455_v9 }
 0x118   : > { %945 = vmatmul.msk.bf16.gmra.mxu1 %vm501_vm1, %v464_v11 }
 0x125   : > { %v535_v15 = vpop.f32.mrf.mxu1 }
 0x126   : > { %v536_v16 = vadd.f32 %v1269_v14, %v535_v15 }
 0x128   : > { %v575_v17 = vmul.f32 0.5, %v536_v16 }
 0x12a   : > { %1044 = vtanh.f32 %v575_v17 }
 0x12d   : > { %v537_v18 = vpop.f32.mrf.mxu1 }
 0x12e   : > { %v538_v19 = vadd.f32 %v1269_v14, %v537_v18 }
 0x130   : > { %v576_v20 = vmul.f32 0.5, %v538_v19  ;;  %v1045_v21 = vpop.eup %1044 }
 0x131   : > { %v607_v24 = vmul.f32 0.5, %v1045_v21 }
 0x132   : > { %1046 = vtanh.f32 %v576_v20 }
 0x133   : > { %v623_v28 = vadd.f32 0.5, %v607_v24 }
 0x135   : > { %v540_v22 = vpop.f32.mrf.mxu1 }
 0x136   : > { %v541_v23 = vadd.f32 %v1269_v14, %v540_v22 }
 0x138   : > { %v1047_v25 = vpop.eup %1046  ;;  %v577_v27 = vmul.f32 0.5, %v541_v23 }
 0x139   : > { %v608_v26 = vmul.f32 0.5, %v1047_v25 }
 0x13a   : > { %1048 = vtanh.f32 %v577_v27 }
 0x13b   : > { %v624_v30 = vadd.f32 0.5, %v608_v26 }
 0x13d   : > { %v542_v31 = vpop.f32.mrf.mxu1  ;;  %v639_v32 = vpack.c.bf16 %v624_v30, %v623_v28 }
 0x13e   : > { %v543_v33 = vadd.f32 %v1269_v14, %v542_v31 }
 0x13f   : > { %723 = vmatmul.bf16.vlgmr.msra.gmra.mxu2 %v639_v32 }
 0x140   : > { %v578_v34 = vmul.f32 0.5, %v543_v33  ;;  %v1049_v35 = vpop.eup %1048 }
 0x141   : > { %v609_v38 = vmul.f32 0.5, %v1049_v35 }
 0x142   : > { %1050 = vtanh.f32 %v578_v34 }
 0x143   : > { %v625_v42 = vadd.f32 0.5, %v609_v38 }
 0x145   : > { %v545_v36 = vpop.f32.mrf.mxu1 }
 0x146   : > { %v546_v37 = vadd.f32 %v1269_v14, %v545_v36 }
 0x148   : > { %v1051_v39 = vpop.eup %1050  ;;  %v579_v41 = vmul.f32 0.5, %v546_v37 }
 0x149   : > { %v610_v40 = vmul.f32 0.5, %v1051_v39 }
 0x14a   : > { %1052 = vtanh.f32 %v579_v41 }
 0x14b   : > { %v626_v43 = vadd.f32 0.5, %v610_v40 }
 0x14d   : > { %v547_v44 = vpop.f32.mrf.mxu1  ;;  %v640_v45 = vpack.c.bf16 %v626_v43, %v625_v42 }
 0x14e   : > { %v548_v46 = vadd.f32 %v1269_v14, %v547_v44 }
 0x14f   : > { %728 = vmatmul.bf16.gmra.mxu2 %v640_v45 }
 0x150   : > { %v580_v47 = vmul.f32 0.5, %v548_v46  ;;  %v1053_v48 = vpop.eup %1052 }
 0x151   : > { %v611_v51 = vmul.f32 0.5, %v1053_v48 }
 0x152   : > { %1054 = vtanh.f32 %v580_v47 }
 0x153   : > { %v627_v55 = vadd.f32 0.5, %v611_v51 }
 0x155   : > { %v550_v49 = vpop.f32.mrf.mxu1 }
 0x156   : > { %v551_v50 = vadd.f32 %v1269_v14, %v550_v49 }
 0x158   : > { %v1055_v52 = vpop.eup %1054  ;;  %v581_v54 = vmul.f32 0.5, %v551_v50 }
 0x159   : > { %v612_v53 = vmul.f32 0.5, %v1055_v52 }
 0x15a   : > { %1056 = vtanh.f32 %v581_v54 }
 0x15b   : > { %v628_v56 = vadd.f32 0.5, %v612_v53 }
 0x15d   : > { %v552_v57 = vpop.f32.mrf.mxu1  ;;  %v641_v58 = vpack.c.bf16 %v628_v56, %v627_v55 }
 0x15e   : > { %v553_v59 = vadd.f32 %v1269_v14, %v552_v57  ;;  %v1290_v57 = vld [vmem:[%s1356_s6] ss:$0 sm:$0xff] }
 0x15f   : > { %733 = vmatmul.bf16.gmra.mxu2 %v641_v58 }
 0x160   : > { %v582_v60 = vmul.f32 0.5, %v553_v59  ;;  %v1057_v61 = vpop.eup %1056 }
 0x161   : > { %v613_v0 = vmul.f32 0.5, %v1057_v61 }
 0x162   : > { %1058 = vtanh.f32 %v582_v60 }
 0x163   : > { %v629_v4 = vadd.f32 0.5, %v613_v0 }
 0x165   : > { %v555_v62 = vpop.f32.mrf.mxu1 }
 0x166   : > { %v556_v63 = vadd.f32 %v1269_v14, %v555_v62 }
 0x168   : > { %v1059_v1 = vpop.eup %1058  ;;  %v583_v3 = vmul.f32 0.5, %v556_v63 }
 0x169   : > { %v614_v2 = vmul.f32 0.5, %v1059_v1 }
 0x16a   : > { %1060 = vtanh.f32 %v583_v3 }
 0x16b   : > { %v630_v5 = vadd.f32 0.5, %v614_v2 }
 0x16d   : > { %v557_v6 = vpop.f32.mrf.mxu1  ;;  %v642_v29 = vpack.c.bf16 %v630_v5, %v629_v4 }
 0x16e   : > { %v558_v7 = vadd.f32 %v1269_v14, %v557_v6 }
 0x16f   : > { %738 = vmatmul.bf16.gmra.mxu2 %v642_v29 }
 0x170   : > { %v584_v8 = vmul.f32 0.5, %v558_v7  ;;  %v1061_v9 = vpop.eup %1060 }
 0x171   : > { %v615_v12 = vmul.f32 0.5, %v1061_v9 }
 0x172   : > { %1062 = vtanh.f32 %v584_v8 }
 0x173   : > { %v631_v17 = vadd.f32 0.5, %v615_v12 }
 0x175   : > { %v560_v10 = vpop.f32.mrf.mxu1 }
 0x176   : > { %v561_v11 = vadd.f32 %v1269_v14, %v560_v10 }
 0x178   : > { %v1063_v13 = vpop.eup %1062  ;;  %v585_v16 = vmul.f32 0.5, %v561_v11 }
 0x179   : > { %v616_v15 = vmul.f32 0.5, %v1063_v13 }
 0x17a   : > { %1064 = vtanh.f32 %v585_v16 }
 0x17b   : > { %v632_v18 = vadd.f32 0.5, %v616_v15 }
 0x17d   : > { %v562_v19 = vpop.f32.mrf.mxu1  ;;  %v643_v20 = vpack.c.bf16 %v632_v18, %v631_v17 }
 0x17e   : > { %v563_v21 = vadd.f32 %v1269_v14, %v562_v19 }
 0x17f   : > { %743 = vmatmul.bf16.gmra.mxu2 %v643_v20 }
 0x180   : > { %v586_v22 = vmul.f32 0.5, %v563_v21  ;;  %v1065_v23 = vpop.eup %1064 }
 0x181   : > { %v617_v26 = vmul.f32 0.5, %v1065_v23 }
 0x182   : > { %1066 = vtanh.f32 %v586_v22 }
 0x183   : > { %v633_v31 = vadd.f32 0.5, %v617_v26 }
 0x185   : > { %v565_v24 = vpop.f32.mrf.mxu1 }
 0x186   : > { %v566_v25 = vadd.f32 %v1269_v14, %v565_v24 }
 0x188   : > { %v1067_v27 = vpop.eup %1066  ;;  %v587_v30 = vmul.f32 0.5, %v566_v25 }
 0x189   : > { %v618_v28 = vmul.f32 0.5, %v1067_v27 }
 0x18a   : > { %1068 = vtanh.f32 %v587_v30 }
 0x18b   : > { %v634_v32 = vadd.f32 0.5, %v618_v28 }
 0x18d   : > { %v567_v33 = vpop.f32.mrf.mxu1  ;;  %v644_v34 = vpack.c.bf16 %v634_v32, %v633_v31 }
 0x18e   : > { %v568_v35 = vadd.f32 %v1269_v14, %v567_v33 }
 0x18f   : > { %748 = vmatmul.bf16.gmra.mxu2 %v644_v34 }
 0x190   : > { %v588_v36 = vmul.f32 0.5, %v568_v35  ;;  %v1069_v37 = vpop.eup %1068 }
 0x191   : > { %v619_v40 = vmul.f32 0.5, %v1069_v37 }
 0x192   : > { %1070 = vtanh.f32 %v588_v36 }
 0x193   : > { %v635_v44 = vadd.f32 0.5, %v619_v40 }
 0x195   : > { %v570_v38 = vpop.f32.mrf.mxu1 }
 0x196   : > { %v571_v39 = vadd.f32 %v1269_v14, %v570_v38 }
 0x198   : > { %v1071_v41 = vpop.eup %1070  ;;  %v589_v43 = vmul.f32 0.5, %v571_v39 }
 0x199   : > { %v620_v42 = vmul.f32 0.5, %v1071_v41 }
 0x19a   : > { %1072 = vtanh.f32 %v589_v43 }
 0x19b   : > { %v636_v45 = vadd.f32 0.5, %v620_v42 }
 0x19d   : > { %v572_v46 = vpop.f32.mrf.mxu1  ;;  %v645_v47 = vpack.c.bf16 %v636_v45, %v635_v44 }
 0x19e   : > { %v573_v48 = vadd.f32 %v1269_v14, %v572_v46 }
 0x19f   : > { %753 = vmatmul.bf16.vlgmr.msra.gmra.mxu3 %v645_v47 }
 0x1a0   : > { %v590_v49 = vmul.f32 0.5, %v573_v48  ;;  %v1073_v50 = vpop.eup %1072 }
 0x1a1   : > { %v621_v51 = vmul.f32 0.5, %v1073_v50 }
 0x1a2   : > { %1074 = vtanh.f32 %v590_v49 }
 0x1a3   : > { %v637_v54 = vadd.f32 0.5, %v621_v51 }
 0x1a8   : > { %v1075_v52 = vpop.eup %1074 }
 0x1a9   : > { %v622_v53 = vmul.f32 0.5, %v1075_v52 }
 0x1ab   : > { %v638_v55 = vadd.f32 0.5, %v622_v53 }
 0x1ad   : > { %v646_v56 = vpack.c.bf16 %v638_v55, %v637_v54 }
 0x1af   : > { %758 = vmatmul.bf16.gmra.mxu3 %v646_v56 }
 0x1c2   : > { %v724_v58 = vpop.f32.mrf.mxu2 }
 0x1c3   : > { %v725_v14 = vadd.f32 %v1290_v57, %v724_v58 }
 0x1c5   : > { %v764_v59 = vmul.f32 0.5, %v725_v14 }
 0x1c7   : > { %1076 = vtanh.f32 %v764_v59 }
 0x1ca   : > { %v726_v60 = vpop.f32.mrf.mxu2 }
 0x1cb   : > { %v727_v61 = vadd.f32 %v1290_v57, %v726_v60 }
 0x1cd   : > { %v1077_v62 = vpop.eup %1076  ;;  %v765_v63 = vmul.f32 0.5, %v727_v61 }
 0x1ce   : > { %v796_v0 = vmul.f32 0.5, %v1077_v62 }
 0x1cf   : > { %1078 = vtanh.f32 %v765_v63 }
 0x1d0   : > { %v812_v1 = vadd.f32 0.5, %v796_v0 }
 0x1d2   : > { %829 = vst.msk [vmem:[%s1299_s22] sm:$0xff] %vm828_vm2, %v812_v1  ;;  %v729_v2 = vpop.f32.mrf.mxu2 }
 0x1d3   : > { %v730_v3 = vadd.f32 %v1290_v57, %v729_v2 }
 0x1d5   : > { %v1079_v4 = vpop.eup %1078  ;;  %v766_v5 = vmul.f32 0.5, %v730_v3 }
 0x1d6   : > { %v797_v6 = vmul.f32 0.5, %v1079_v4 }
 0x1d7   : > { %1080 = vtanh.f32 %v766_v5 }
 0x1d8   : > { %v813_v29 = vadd.f32 0.5, %v797_v6 }
 0x1da   : > { %830 = vst.msk [vmem:[%s1299_s22 + $0x8] sm:$0xff] %vm828_vm2, %v813_v29  ;;  %v731_v7 = vpop.f32.mrf.mxu2 }
 0x1db   : > { %v732_v8 = vadd.f32 %v1290_v57, %v731_v7 }
 0x1dd   : > { %v1081_v9 = vpop.eup %1080  ;;  %v767_v10 = vmul.f32 0.5, %v732_v8 }
 0x1de   : > { %v798_v11 = vmul.f32 0.5, %v1081_v9 }
 0x1df   : > { %1082 = vtanh.f32 %v767_v10 }
 0x1e0   : > { %v814_v12 = vadd.f32 0.5, %v798_v11 }
 0x1e2   : > { %831 = vst.msk [vmem:[%s1299_s22 + $0x10] sm:$0xff] %vm828_vm2, %v814_v12  ;;  %v734_v13 = vpop.f32.mrf.mxu2 }
 0x1e3   : > { %v735_v15 = vadd.f32 %v1290_v57, %v734_v13 }
 0x1e5   : > { %v1083_v16 = vpop.eup %1082  ;;  %v768_v17 = vmul.f32 0.5, %v735_v15 }
 0x1e6   : > { %v799_v18 = vmul.f32 0.5, %v1083_v16 }
 0x1e7   : > { %1084 = vtanh.f32 %v768_v17 }
 0x1e8   : > { %v815_v19 = vadd.f32 0.5, %v799_v18 }
 0x1ea   : > { %832 = vst.msk [vmem:[%s1299_s22 + $0x18] sm:$0xff] %vm828_vm2, %v815_v19  ;;  %v736_v20 = vpop.f32.mrf.mxu2 }
 0x1eb   : > { %v737_v21 = vadd.f32 %v1290_v57, %v736_v20 }
 0x1ed   : > { %v1085_v22 = vpop.eup %1084  ;;  %v769_v23 = vmul.f32 0.5, %v737_v21 }
 0x1ee   : > { %v800_v24 = vmul.f32 0.5, %v1085_v22 }
 0x1ef   : > { %1086 = vtanh.f32 %v769_v23 }
 0x1f0   : > { %v816_v25 = vadd.f32 0.5, %v800_v24 }
 0x1f2   : > { %833 = vst.msk [vmem:[%s1299_s22 + $0x20] sm:$0xff] %vm828_vm2, %v816_v25  ;;  %v739_v26 = vpop.f32.mrf.mxu2 }
 0x1f3   : > { %v740_v27 = vadd.f32 %v1290_v57, %v739_v26 }
 0x1f5   : > { %v1087_v28 = vpop.eup %1086  ;;  %v770_v30 = vmul.f32 0.5, %v740_v27 }
 0x1f6   : > { %v801_v31 = vmul.f32 0.5, %v1087_v28 }
 0x1f7   : > { %1088 = vtanh.f32 %v770_v30 }
 0x1f8   : > { %v817_v32 = vadd.f32 0.5, %v801_v31 }
 0x1fa   : > { %834 = vst.msk [vmem:[%s1299_s22 + $0x28] sm:$0xff] %vm828_vm2, %v817_v32  ;;  %v741_v33 = vpop.f32.mrf.mxu2 }
 0x1fb   : > { %v742_v34 = vadd.f32 %v1290_v57, %v741_v33 }
 0x1fd   : > { %v1089_v35 = vpop.eup %1088  ;;  %v771_v36 = vmul.f32 0.5, %v742_v34 }
 0x1fe   : > { %v802_v37 = vmul.f32 0.5, %v1089_v35 }
 0x1ff   : > { %1090 = vtanh.f32 %v771_v36 }
 0x200   : > { %v818_v38 = vadd.f32 0.5, %v802_v37 }
 0x202   : > { %835 = vst.msk [vmem:[%s1299_s22 + $0x30] sm:$0xff] %vm828_vm2, %v818_v38  ;;  %v744_v39 = vpop.f32.mrf.mxu2 }
 0x203   : > { %v745_v40 = vadd.f32 %v1290_v57, %v744_v39 }
 0x205   : > { %v1091_v41 = vpop.eup %1090  ;;  %v772_v42 = vmul.f32 0.5, %v745_v40 }
 0x206   : > { %v803_v43 = vmul.f32 0.5, %v1091_v41 }
 0x207   : > { %1092 = vtanh.f32 %v772_v42 }
 0x208   : > { %v819_v44 = vadd.f32 0.5, %v803_v43 }
 0x20a   : > { %836 = vst.msk [vmem:[%s1299_s22 + $0x38] sm:$0xff] %vm828_vm2, %v819_v44  ;;  %v746_v45 = vpop.f32.mrf.mxu2 }
 0x20b   : > { %v747_v46 = vadd.f32 %v1290_v57, %v746_v45 }
 0x20d   : > { %v1093_v47 = vpop.eup %1092  ;;  %v773_v48 = vmul.f32 0.5, %v747_v46 }
 0x20e   : > { %v804_v49 = vmul.f32 0.5, %v1093_v47 }
 0x20f   : > { %1094 = vtanh.f32 %v773_v48 }
 0x210   : > { %v820_v50 = vadd.f32 0.5, %v804_v49 }
 0x212   : > { %837 = vst.msk [vmem:[%s1299_s22 + $0x40] sm:$0xff] %vm828_vm2, %v820_v50  ;;  %v749_v51 = vpop.f32.mrf.mxu2 }
 0x213   : > { %v750_v52 = vadd.f32 %v1290_v57, %v749_v51 }
 0x215   : > { %v1095_v53 = vpop.eup %1094  ;;  %v774_v54 = vmul.f32 0.5, %v750_v52 }
 0x216   : > { %v805_v55 = vmul.f32 0.5, %v1095_v53 }
 0x217   : > { %1096 = vtanh.f32 %v774_v54 }
 0x218   : > { %v821_v56 = vadd.f32 0.5, %v805_v55 }
 0x21a   : > { %838 = vst.msk [vmem:[%s1299_s22 + $0x48] sm:$0xff] %vm828_vm2, %v821_v56  ;;  %v751_v58 = vpop.f32.mrf.mxu2 }
 0x21b   : > { %v752_v14 = vadd.f32 %v1290_v57, %v751_v58 }
 0x21d   : > { %v1097_v59 = vpop.eup %1096  ;;  %v775_v60 = vmul.f32 0.5, %v752_v14 }
 0x21e   : > { %v806_v61 = vmul.f32 0.5, %v1097_v59 }
 0x21f   : > { %1098 = vtanh.f32 %v775_v60 }
 0x220   : > { %v822_v62 = vadd.f32 0.5, %v806_v61 }
 0x222   : > { %839 = vst.msk [vmem:[%s1299_s22 + $0x50] sm:$0xff] %vm828_vm2, %v822_v62  ;;  %v754_v63 = vpop.f32.mrf.mxu3 }
 0x223   : > { %v755_v0 = vadd.f32 %v1290_v57, %v754_v63 }
 0x225   : > { %v1099_v1 = vpop.eup %1098  ;;  %v776_v2 = vmul.f32 0.5, %v755_v0 }
 0x226   : > { %v807_v3 = vmul.f32 0.5, %v1099_v1 }
 0x227   : > { %1100 = vtanh.f32 %v776_v2 }
 0x228   : > { %v823_v4 = vadd.f32 0.5, %v807_v3 }
 0x22a   : > { %840 = vst.msk [vmem:[%s1299_s22 + $0x58] sm:$0xff] %vm828_vm2, %v823_v4  ;;  %v756_v5 = vpop.f32.mrf.mxu3 }
 0x22b   : > { %v757_v6 = vadd.f32 %v1290_v57, %v756_v5 }
 0x22d   : > { %v1101_v29 = vpop.eup %1100  ;;  %v777_v7 = vmul.f32 0.5, %v757_v6 }
 0x22e   : > { %v808_v8 = vmul.f32 0.5, %v1101_v29 }
 0x22f   : > { %1102 = vtanh.f32 %v777_v7 }
 0x230   : > { %v824_v9 = vadd.f32 0.5, %v808_v8 }
 0x232   : > { %841 = vst.msk [vmem:[%s1299_s22 + $0x60] sm:$0xff] %vm828_vm2, %v824_v9  ;;  %v759_v10 = vpop.f32.mrf.mxu3 }
 0x233   : > { %v760_v11 = vadd.f32 %v1290_v57, %v759_v10 }
 0x235   : > { %v1103_v12 = vpop.eup %1102  ;;  %v778_v13 = vmul.f32 0.5, %v760_v11 }
 0x236   : > { %v809_v15 = vmul.f32 0.5, %v1103_v12 }
 0x237   : > { %1104 = vtanh.f32 %v778_v13 }
 0x238   : > { %v825_v16 = vadd.f32 0.5, %v809_v15 }
 0x23a   : > { %842 = vst.msk [vmem:[%s1299_s22 + $0x68] sm:$0xff] %vm828_vm2, %v825_v16  ;;  %v761_v17 = vpop.f32.mrf.mxu3 }
 0x23b   : > { %v762_v18 = vadd.f32 %v1290_v57, %v761_v17 }
 0x23d   : > { %v1105_v19 = vpop.eup %1104  ;;  %v779_v20 = vmul.f32 0.5, %v762_v18 }
 0x23e   : > { %v810_v21 = vmul.f32 0.5, %v1105_v19 }
 0x23f   : > { %1106 = vtanh.f32 %v779_v20 }
 0x240   : > { %v826_v22 = vadd.f32 0.5, %v810_v21 }
 0x242   : > { %843 = vst.msk [vmem:[%s1299_s22 + $0x70] sm:$0xff] %vm828_vm2, %v826_v22 }
 0x245   : > { %v1107_v23 = vpop.eup %1106 }
 0x246   : > { %v811_v24 = vmul.f32 0.5, %v1107_v23 }
 0x248   : > { %v827_v25 = vadd.f32 0.5, %v811_v24 }
 0x24a   : > { %844 = vst.msk [vmem:[%s1299_s22 + $0x78] sm:$0xff] %vm828_vm2, %v827_v25 }
 0x24b PF: > { %s17_s24 = sadd.s32 1, %s1114_s24  }
 0x24c   : > { %p14_p4 = scmp.ge.s32.totalorder %s17_s24, 4  }
 0x24e   :  { %16 = sbr.rel (!%p14_p4) target bundleno = 1 (0x1), region = 78 }

</bundles_post_ra>
